<compile_context>
chip_gen: v7x
topology: tpu7x:2x2x1
jax: 0.10.0
libtpu: 0.0.40
codegen_flags: <defaults>
</compile_context>

<pallas_src>
import functools

import jax
import jax.numpy as jnp
from jax.experimental import pallas as pl
from jax.experimental.pallas import tpu as pltpu

_VMEM_LIMIT = 32 * 1024 * 1024  # explicit scoped-VMEM cap; safe on v5e/v6e/v7x


def _stats_kernel(x_ref, w_ref, gb_ref, ab_ref, sum_ref, sq_ref,
                  *, n_rows, tile_n, eps):
    i = pl.program_id(0)

    @pl.when(i == 0)
    def _():
        sum_ref[...] = jnp.zeros_like(sum_ref)
        sq_ref[...] = jnp.zeros_like(sq_ref)

    # y = x @ W^T : contract the Cin dim of x (tile_n, Cin) with the Cin dim
    # of the PyTorch-layout weight (Cout, Cin). Native-dtype operands, f32 acc.
    y = jax.lax.dot_general(
        x_ref[...], w_ref[...],
        dimension_numbers=(((1,), (1,)), ((), ())),
        preferred_element_type=jnp.float32)

    # Mask rows past the true batch size (partial last tile).
    row = i * tile_n + jax.lax.broadcasted_iota(jnp.int32, y.shape, 0)
    y = jnp.where(row < n_rows, y, 0.0)

    sum_ref[...] += jnp.sum(y, axis=0, keepdims=True)
    sq_ref[...] += jnp.sum(y * y, axis=0, keepdims=True)

    @pl.when(i == pl.num_programs(0) - 1)
    def _():
        inv_n = jnp.float32(1.0 / n_rows)
        mean = sum_ref[...] * inv_n
        var = sq_ref[...] * inv_n - mean * mean        # biased (training-mode BN)
        gamma = gb_ref[0:1, :].astype(jnp.float32)
        beta = gb_ref[1:2, :].astype(jnp.float32)
        scale = gamma * jax.lax.rsqrt(var + eps)       # rsqrt -> EUP slot
        ab_ref[0:1, :] = scale
        ab_ref[1:2, :] = beta - mean * scale           # folded affine shift


def _apply_kernel(x_ref, w_ref, ab_ref, o_ref, *, act):
    y = jax.lax.dot_general(
        x_ref[...], w_ref[...],
        dimension_numbers=(((1,), (1,)), ((), ())),
        preferred_element_type=jnp.float32)
    y = y * ab_ref[0:1, :] + ab_ref[1:2, :]            # folded BN affine (2 VALU ops)
    if act == "relu":
        y = jnp.maximum(y, 0.0)
    elif callable(act):
        y = act(y)
    o_ref[...] = y.astype(o_ref.dtype)


def _choose_tile_n(n, cin, cout, itemsize):
    # Per-row VMEM cost: double-buffered x and out tiles + the f32 y in flight.
    # Budget well under the scoped limit so double-buffering survives v7x's
    # 64 MiB physical VMEM.
    per_row = 2 * (cin + cout) * itemsize + 4 * cout
    budget = 8 * 1024 * 1024
    t = max(8, min(1024, budget // max(per_row, 1)))
    t = (t // 8) * 8                         # sublane alignment
    t = min(t, ((n + 7) // 8) * 8)           # never bigger than the padded batch
    return max(t, 8)


def linear_bn(x, weight, bias, gamma, beta, *, eps=1e-5, act=None, tile_n=None):
    """Forward of LinearBn. x: (..., Cin); weight: (Cout, Cin)."""
    del bias  # cancelled exactly by the training-mode BN mean subtraction
    orig_shape = x.shape
    cin = orig_shape[-1]
    cout = weight.shape[0]
    x2 = x.reshape(-1, cin)
    n = x2.shape[0]

    gb = jnp.stack([gamma, beta]).astype(jnp.float32)   # packed (2, Cout)

    if tile_n is None:
        tile_n = _choose_tile_n(n, cin, cout, x2.dtype.itemsize)
    grid = (pl.cdiv(n, tile_n),)

    x_spec = pl.BlockSpec((tile_n, cin), lambda i: (i, 0))
    w_spec = pl.BlockSpec((cout, cin), lambda i: (0, 0))     # weight stays resident
    vec_spec = pl.BlockSpec((2, cout), lambda i: (0, 0))     # resident (2, Cout) vectors

    # Pass 1: per-channel sum / sumsq over all N tiles -> folded (scale, shift).
    ab = pl.pallas_call(
        functools.partial(_stats_kernel, n_rows=n, tile_n=tile_n, eps=eps),
        out_shape=jax.ShapeDtypeStruct((2, cout), jnp.float32),
        grid=grid,
        in_specs=[x_spec, w_spec, vec_spec],
        out_specs=vec_spec,
        scratch_shapes=[pltpu.VMEM((1, cout), jnp.float32),
                        pltpu.VMEM((1, cout), jnp.float32)],
        compiler_params=pltpu.CompilerParams(
            dimension_semantics=("arbitrary",),
            vmem_limit_bytes=_VMEM_LIMIT),
    )(x2, weight, gb)

    # Pass 2: recompute y per tile, apply scale/shift (+ optional activation).
    # Fully parallel over N (megacore / v7x dual-TC friendly), lane-dense Cout
    # last dim in the output blocks.
    out = pl.pallas_call(
        functools.partial(_apply_kernel, act=act),
        out_shape=jax.ShapeDtypeStruct((n, cout), x.dtype),
        grid=grid,
        in_specs=[x_spec, w_spec, vec_spec],
        out_specs=pl.BlockSpec((tile_n, cout), lambda i: (i, 0)),
        compiler_params=pltpu.CompilerParams(
            dimension_semantics=("parallel",),
            vmem_limit_bytes=_VMEM_LIMIT),
    )(x2, weight, ab)

    return out.reshape(orig_shape[:-1] + (cout,))


def _reference(x, weight, bias, gamma, beta, eps=1e-5, act=None):
    orig_shape = x.shape
    y = x.reshape(-1, orig_shape[-1]) @ weight.T + bias
    mean = jnp.mean(y, axis=0, keepdims=True)
    var = jnp.mean((y - mean) ** 2, axis=0, keepdims=True)
    y = (y - mean) / jnp.sqrt(var + eps) * gamma + beta
    if act == "relu":
        y = jnp.maximum(y, 0.0)
    return y.reshape(orig_shape[:-1] + (weight.shape[0],))


if __name__ == "__main__":
    key = jax.random.PRNGKey(0)
    k_x1, k_x2, k_w, k_b = jax.random.split(key, 4)

    Cin, Cout = 32, 128
    bound = 1.0 / (Cin ** 0.5)
    weight = jax.random.uniform(k_w, (Cout, Cin), jnp.float32, -bound, bound)
    bias = jax.random.uniform(k_b, (Cout,), jnp.float32, -bound, bound)
    gamma = jnp.ones((Cout,), jnp.float32)    # BatchNorm1d default weight
    beta = jnp.zeros((Cout,), jnp.float32)    # BatchNorm1d default bias

    # Test 1: 2-D input, single tile, default act (None).
    x1 = jax.random.normal(k_x1, (8, Cin), dtype=jnp.float32)
    out1 = jax.block_until_ready(linear_bn(x1, weight, bias, gamma, beta))
    ref1 = _reference(x1, weight, bias, gamma, beta)
    assert out1.shape == (8, Cout)
    assert jnp.allclose(out1, ref1, atol=1e-4, rtol=1e-4), "mismatch (test 1)"

    # Test 2: 3-D input (BN flattens leading dims), multi-tile grid with a
    # partial last tile (20 rows, tile_n=8) and relu activation.
    x2 = jax.random.normal(k_x2, (2, 10, Cin), dtype=jnp.float32)
    out2 = jax.block_until_ready(
        linear_bn(x2, weight, bias, gamma, beta, act="relu", tile_n=8))
    ref2 = _reference(x2, weight, bias, gamma, beta, act="relu")
    assert out2.shape == (2, 10, Cout)
    assert jnp.allclose(out2, ref2, atol=1e-4, rtol=1e-4), "mismatch (test 2)"

    print("KERNEL_OK")
</pallas_src>

<mosaic_0001>
module attributes {stable_mosaic.version = 11 : i64} {
  func.func @_stats_kernel(%arg0: i32, %arg1: memref<8x32xf32, #tpu.memory_space<vmem>>, %arg2: memref<128x32xf32, #tpu.memory_space<vmem>>, %arg3: memref<2x128xf32, #tpu.memory_space<vmem>>, %arg4: memref<2x128xf32, #tpu.memory_space<vmem>>, %arg5: memref<1x128xf32, #tpu.memory_space<vmem>>, %arg6: memref<1x128xf32, #tpu.memory_space<vmem>>) attributes {dimension_semantics = [#tpu.dimension_semantics<arbitrary>], iteration_bounds = array<i64: 1>, scalar_prefetch = 0 : i64, scratch_operands = 2 : i64, tpu.core_type = #tpu.core_type<tc>, window_params = [{transform_indices = @transform_0, window_bounds = array<i64: 8, 32>}, {pipeline_mode = #tpu.pipeline_mode<synchronous>, transform_indices = @transform_1, window_bounds = array<i64: 128, 32>}, {pipeline_mode = #tpu.pipeline_mode<synchronous>, transform_indices = @transform_2, window_bounds = array<i64: 2, 128>}, {pipeline_mode = #tpu.pipeline_mode<synchronous>, transform_indices = @transform_3, window_bounds = array<i64: 2, 128>}]} {
    %c0_i32 = arith.constant 0 : i32
    %0 = arith.cmpi eq, %arg0, %c0_i32 : i32
    %1 = arith.extui %0 : i1 to i32
    %c0_i32_0 = arith.constant 0 : i32
    %2 = arith.cmpi ne, %1, %c0_i32_0 : i32
    scf.if %2 {
      %cst_18 = arith.constant 0.000000e+00 : f32
      %28 = vector.broadcast %cst_18 : f32 to vector<1x128xf32>
      %c0_19 = arith.constant 0 : index
      %c0_20 = arith.constant 0 : index
      %29 = vector.load %arg5[%c0_19, %c0_20] : memref<1x128xf32, #tpu.memory_space<vmem>>, vector<1x128xf32>
      tpu.vector_store %arg5[%c0_19, %c0_20], %28 {strides = array<i32>} : memref<1x128xf32, #tpu.memory_space<vmem>>, vector<1x128xf32>,
      %cst_21 = arith.constant 0.000000e+00 : f32
      %30 = vector.broadcast %cst_21 : f32 to vector<1x128xf32>
      %c0_22 = arith.constant 0 : index
      %c0_23 = arith.constant 0 : index
      %31 = vector.load %arg6[%c0_22, %c0_23] : memref<1x128xf32, #tpu.memory_space<vmem>>, vector<1x128xf32>
      tpu.vector_store %arg6[%c0_22, %c0_23], %30 {strides = array<i32>} : memref<1x128xf32, #tpu.memory_space<vmem>>, vector<1x128xf32>,
    } else {
    }
    %c0 = arith.constant 0 : index
    %c0_1 = arith.constant 0 : index
    %3 = vector.load %arg1[%c0, %c0_1] : memref<8x32xf32, #tpu.memory_space<vmem>>, vector<8x32xf32>
    %c0_2 = arith.constant 0 : index
    %c0_3 = arith.constant 0 : index
    %4 = vector.load %arg2[%c0_2, %c0_3] : memref<128x32xf32, #tpu.memory_space<vmem>>, vector<128x32xf32>
    %cst = arith.constant dense<0.000000e+00> : vector<8x128xf32>
    %5 = tpu.matmul %3, %4, %cst {dimension_numbers = #tpu.dot_dimension_numbers<[1], [1], [0], [0], [0, 0, 1, 0], [], []>} : vector<8x32xf32>, vector<128x32xf32>, vector<8x128xf32> -> vector<8x128xf32>
    %c8_i32 = arith.constant 8 : i32
    %6 = arith.muli %arg0, %c8_i32 : i32
    %7 = tpu.iota {dimensions = array<i32: 0>} : vector<8x128xi32>
    %8 = vector.broadcast %6 : i32 to vector<8x128xi32>
    %9 = arith.addi %8, %7 : vector<8x128xi32>
    %c8_i32_4 = arith.constant 8 : i32
    %10 = vector.broadcast %c8_i32_4 : i32 to vector<8x128xi32>
    %11 = arith.cmpi slt, %9, %10 : vector<8x128xi32>
    %cst_5 = arith.constant 0.000000e+00 : f32
    %12 = vector.broadcast %cst_5 : f32 to vector<8x128xf32>
    %13 = arith.select %11, %5, %12 : vector<8x128xi1>, vector<8x128xf32>
    %c0_6 = arith.constant 0 : index
    %c0_7 = arith.constant 0 : index
    %14 = vector.load %arg5[%c0_6, %c0_7] : memref<1x128xf32, #tpu.memory_space<vmem>>, vector<1x128xf32>
    %cst_8 = arith.constant dense<0.000000e+00> : vector<128xf32>
    %15 = vector.multi_reduction <add>, %13, %cst_8 [0] : vector<8x128xf32> to vector<128xf32>
    %16 = vector.shape_cast %15 : vector<128xf32> to vector<1x128xf32>
    %17 = arith.addf %14, %16 : vector<1x128xf32>
    %c0_9 = arith.constant 0 : index
    %c0_10 = arith.constant 0 : index
    %18 = vector.load %arg5[%c0_9, %c0_10] : memref<1x128xf32, #tpu.memory_space<vmem>>, vector<1x128xf32>
    tpu.vector_store %arg5[%c0_9, %c0_10], %17 {strides = array<i32>} : memref<1x128xf32, #tpu.memory_space<vmem>>, vector<1x128xf32>,
    %c0_11 = arith.constant 0 : index
    %c0_12 = arith.constant 0 : index
    %19 = vector.load %arg6[%c0_11, %c0_12] : memref<1x128xf32, #tpu.memory_space<vmem>>, vector<1x128xf32>
    %20 = arith.mulf %13, %13 : vector<8x128xf32>
    %cst_13 = arith.constant dense<0.000000e+00> : vector<128xf32>
    %21 = vector.multi_reduction <add>, %20, %cst_13 [0] : vector<8x128xf32> to vector<128xf32>
    %22 = vector.shape_cast %21 : vector<128xf32> to vector<1x128xf32>
    %23 = arith.addf %19, %22 : vector<1x128xf32>
    %c0_14 = arith.constant 0 : index
    %c0_15 = arith.constant 0 : index
    %24 = vector.load %arg6[%c0_14, %c0_15] : memref<1x128xf32, #tpu.memory_space<vmem>>, vector<1x128xf32>
    tpu.vector_store %arg6[%c0_14, %c0_15], %23 {strides = array<i32>} : memref<1x128xf32, #tpu.memory_space<vmem>>, vector<1x128xf32>,
    %c0_i32_16 = arith.constant 0 : i32
    %25 = arith.cmpi eq, %arg0, %c0_i32_16 : i32
    %26 = arith.extui %25 : i1 to i32
    %c0_i32_17 = arith.constant 0 : i32
    %27 = arith.cmpi ne, %26, %c0_i32_17 : i32
    scf.if %27 {
      %c0_18 = arith.constant 0 : index
      %c0_19 = arith.constant 0 : index
      %28 = vector.load %arg5[%c0_18, %c0_19] : memref<1x128xf32, #tpu.memory_space<vmem>>, vector<1x128xf32>
      %cst_20 = arith.constant 1.250000e-01 : f32
      %29 = vector.broadcast %cst_20 : f32 to vector<1x128xf32>
      %30 = arith.mulf %28, %29 : vector<1x128xf32>
      %c0_21 = arith.constant 0 : index
      %c0_22 = arith.constant 0 : index
      %31 = vector.load %arg6[%c0_21, %c0_22] : memref<1x128xf32, #tpu.memory_space<vmem>>, vector<1x128xf32>
      %cst_23 = arith.constant 1.250000e-01 : f32
      %32 = vector.broadcast %cst_23 : f32 to vector<1x128xf32>
      %33 = arith.mulf %31, %32 : vector<1x128xf32>
      %34 = arith.mulf %30, %30 : vector<1x128xf32>
      %35 = arith.subf %33, %34 : vector<1x128xf32>
      %c0_24 = arith.constant 0 : index
      %c0_25 = arith.constant 0 : index
      %36 = vector.load %arg3[%c0_24, %c0_25] : memref<2x128xf32, #tpu.memory_space<vmem>>, vector<1x128xf32>
      %c1 = arith.constant 1 : index
      %c0_26 = arith.constant 0 : index
      %37 = vector.load %arg3[%c1, %c0_26] : memref<2x128xf32, #tpu.memory_space<vmem>>, vector<1x128xf32>
      %cst_27 = arith.constant 9.99999974E-6 : f32
      %38 = vector.broadcast %cst_27 : f32 to vector<1x128xf32>
      %39 = arith.addf %35, %38 : vector<1x128xf32>
      %40 = math.rsqrt %39 : vector<1x128xf32>
      %41 = arith.mulf %36, %40 : vector<1x128xf32>
      %c0_28 = arith.constant 0 : index
      %c0_29 = arith.constant 0 : index
      %42 = vector.load %arg4[%c0_28, %c0_29] : memref<2x128xf32, #tpu.memory_space<vmem>>, vector<1x128xf32>
      tpu.vector_store %arg4[%c0_28, %c0_29], %41 {strides = array<i32>} : memref<2x128xf32, #tpu.memory_space<vmem>>, vector<1x128xf32>,
      %43 = arith.mulf %30, %41 : vector<1x128xf32>
      %44 = arith.subf %37, %43 : vector<1x128xf32>
      %c1_30 = arith.constant 1 : index
      %c0_31 = arith.constant 0 : index
      %45 = vector.load %arg4[%c1_30, %c0_31] : memref<2x128xf32, #tpu.memory_space<vmem>>, vector<1x128xf32>
      tpu.vector_store %arg4[%c1_30, %c0_31], %44 {strides = array<i32>} : memref<2x128xf32, #tpu.memory_space<vmem>>, vector<1x128xf32>,
    } else {
    }
    return
  }
  func.func @transform_0(%arg0: i32) -> (i32, i32) {
    %c0_i32 = arith.constant 0 : i32
    %c0_i32_0 = arith.constant 0 : i32
    return %arg0, %c0_i32 : i32, i32
  }
  func.func @transform_1(%arg0: i32) -> (i32, i32) {
    %c0_i32 = arith.constant 0 : i32
    %c0_i32_0 = arith.constant 0 : i32
    %c0_i32_1 = arith.constant 0 : i32
    return %c0_i32, %c0_i32_0 : i32, i32
  }
  func.func @transform_2(%arg0: i32) -> (i32, i32) {
    %c0_i32 = arith.constant 0 : i32
    %c0_i32_0 = arith.constant 0 : i32
    %c0_i32_1 = arith.constant 0 : i32
    return %c0_i32, %c0_i32_0 : i32, i32
  }
  func.func @transform_3(%arg0: i32) -> (i32, i32) {
    %c0_i32 = arith.constant 0 : i32
    %c0_i32_0 = arith.constant 0 : i32
    %c0_i32_1 = arith.constant 0 : i32
    return %c0_i32, %c0_i32_0 : i32, i32
  }
}

</mosaic_0001>

<bundles_post_ra>
// kernel: tpu_custom_call.1
= control target key start
LH: loop header
LB: loop body
LE: loop exit
PB: predicated region body
PF: predicated region fallthrough
CT: control target
= control target key end

     0   :  { %vm38_vm0 = vcmask 261120   ;;  %v349_v2 = vmov 0.0|0.0   ;;  %v350_v5 = vmov 0.0   ;;  %vm351_vm2 = vmmov 0   ;;  %s465_s0 = inlined_call_operand.vmem [shape: f32[8,32], index: 0, kind: input, shape index: {}]   ;;  %s466_s1 = inlined_call_operand.vmem [shape: f32[128,32], index: 1, kind: input, shape index: {}]   ;;  %s467_s2 = inlined_call_operand.vmem [shape: f32[2,128], index: 2, kind: input, shape index: {}]   ;;  %s468_s3 = inlined_call_operand.hbm [shape: f32[2,128], index: 3, kind: output, shape index: {}]  }
   0x1   :  { %v22_v0 = vld [vmem:[%s466_s1] sm:$0xff]  ;;  %v23_v1 = vld [vmem:[%s466_s1 + $0x8] sm:$0xff]  ;;  %287 = vmatprep.subr.bf16.mxu0 %v349_v2  ;;  %vm381_vm1 = vmpackc.low %vm38_vm0, %vm38_vm0  ;;  %19 = vst [vmem:[#allocation2] sm:$0x1] %v350_v5  ;;  %284 = vmatprep.mubr.msk.f32.mxu0 %vm351_vm2, %v350_v5 }
   0x2   :  { %v288_v3 = vpack.c.bf16 %v23_v1, %v22_v0  ;;  %20 = vst [vmem:[#allocation3] sm:$0x1] %v350_v5  ;;  %v24_v6 = vld [vmem:[%s466_s1 + $0x10] sm:$0xff]  ;;  %v25_v7 = vld [vmem:[%s466_s1 + $0x18] sm:$0xff] }
   0x4   :  { %290 = vmatpush3.bf16.xpose.msk.msra.mxu0 %vm381_vm1, %v288_v3 }
   0x5   :  { %291 = vmatprep.subr.bf16.mxu0 %v349_v2 }
   0x6   :  { %8 = vsyncpa [#allocation5], 0  ;;  %v292_v8 = vpack.c.bf16 %v25_v7, %v24_v6  ;;  %v26_v9 = vld [vmem:[%s466_s1 + $0x20] sm:$0xff]  ;;  %v27_v10 = vld [vmem:[%s466_s1 + $0x28] sm:$0xff]  ;;  %s352_s21 = smov [#allocation4]  }
   0x7   :  { %v296_v11 = vpack.c.bf16 %v27_v10, %v26_v9  ;;  %v28_v12 = vld [vmem:[%s466_s1 + $0x30] sm:$0xff]  ;;  %v29_v13 = vld [vmem:[%s466_s1 + $0x38] sm:$0xff]  ;;  %v30_v15 = vld [vmem:[%s466_s1 + $0x40] sm:$0xff]  ;;  %s210_s22 = sshll.u32 %s352_s21, 4  ;;  %s211_s22 = int_to_ptr.vmem [resolvable:$true] %s210_s22 }
   0x8   :  { %v300_v14 = vpack.c.bf16 %v29_v13, %v28_v12  ;;  %v31_v16 = vld [vmem:[%s466_s1 + $0x48] sm:$0xff]  ;;  %v32_v18 = vld [vmem:[%s466_s1 + $0x50] sm:$0xff]  ;;  %v33_v19 = vld [vmem:[%s466_s1 + $0x58] sm:$0xff]  ;;  %s325_s23 = scalar_lea.vmem %s211_s22, 32  ;;  %p330_p1 = scmp.lt.s32.totalorder %s211_s22, %s211_s22 }
   0x9   :  { %v304_v17 = vpack.c.bf16 %v31_v16, %v30_v15  ;;  %v308_v20 = vpack.c.bf16 %v33_v19, %v32_v18  ;;  %v34_v21 = vld [vmem:[%s466_s1 + $0x60] sm:$0xff]  ;;  %v35_v22 = vld [vmem:[%s466_s1 + $0x68] sm:$0xff]  ;;  %v36_v24 = vld [vmem:[%s466_s1 + $0x70] sm:$0xff]  ;;  %p326_p0 = scmp.ne.s32.totalorder %s211_s22, %s325_s23  ;;  %p331_p2 = scmp.lt.s32.totalorder %s325_s23, %s325_s23 }
   0xa   :  { %v312_v23 = vpack.c.bf16 %v35_v22, %v34_v21  ;;  %v37_v25 = vld [vmem:[%s466_s1 + $0x78] sm:$0xff]  ;;  %v21_v27 = vld [vmem:[%s465_s0] sm:$0xff] }
   0xb   :  { %v316_v26 = vpack.c.bf16 %v37_v25, %v36_v24  ;;  %v167_v40 = vld [vmem:[#allocation2] sm:$0x1]  ;;  %v176_v43 = vld [vmem:[#allocation3] sm:$0x1]  ;;  %p332_p3 = por %p331_p2, %p330_p1 }
   0xc   :  { %294 = vmatpush3.bf16.xpose.msk.msra.mxu0 %vm381_vm1, %v292_v8  ;;  %v195_v54 = vld [vmem:[%s467_s2] sm:$0x1]  ;;  %v196_v57 = vld [vmem:[%s467_s2 + $0x1] sm:$0x1] }
   0xd   :  { %295 = vmatprep.subr.bf16.mxu0 %v349_v2  ;;  %p333_p4 = pnand %p332_p3, %p326_p0 }
  0x14   :  { %298 = vmatpush3.bf16.xpose.msk.msra.mxu0 %vm381_vm1, %v296_v11 }
  0x15   :  { %299 = vmatprep.subr.bf16.mxu0 %v349_v2 }
  0x1c   :  { %302 = vmatpush3.bf16.xpose.msk.msra.mxu0 %vm381_vm1, %v300_v14 }
  0x1d   :  { %303 = vmatprep.subr.bf16.mxu0 %v349_v2 }
  0x24   :  { %306 = vmatpush3.bf16.xpose.msk.msra.mxu0 %vm381_vm1, %v304_v17 }
  0x25   :  { %307 = vmatprep.subr.bf16.mxu0 %v349_v2 }
  0x2c   :  { %310 = vmatpush3.bf16.xpose.msk.msra.mxu0 %vm381_vm1, %v308_v20 }
  0x2d   :  { %311 = vmatprep.subr.bf16.mxu0 %v349_v2 }
  0x34   :  { %314 = vmatpush3.bf16.xpose.msk.msra.mxu0 %vm381_vm1, %v312_v23 }
  0x35   :  { %315 = vmatprep.subr.bf16.mxu0 %v349_v2 }
  0x3c   :  { %318 = vmatpush3.bf16.xpose.msk.msra.mxu0 %vm381_vm1, %v316_v26 }
  0x43   :  { %285 = vmatmul.mubr.msk.f32.vlgmr.msra.gmra.mrb[0].mxu0 %vm38_vm0, %v21_v27 }
 0x116   :  { %v156_v28 = vpop.f32.mrb[0].mxu0 }
 0x117   :  { %v168_v29 = vrot.slane %v156_v28, 4  ;;  %v177_v30 = vmul.f32 %v156_v28, %v156_v28  ;;  %v286_v31 = vpop.f32.mrb[1].mxu0 }
 0x119   :  { %v169_v32 = vadd.f32 %v168_v29, %v156_v28  ;;  %v178_v33 = vrot.slane %v177_v30, 4 }
 0x11b   :  { %v170_v34 = vrot.slane %v169_v32, 2  ;;  %v179_v35 = vadd.f32 %v178_v33, %v177_v30 }
 0x11d   :  { %v171_v36 = vadd.f32 %v170_v34, %v169_v32  ;;  %v180_v37 = vrot.slane %v179_v35, 2 }
 0x11f   :  { %v172_v38 = vrot.slane %v171_v36, 1  ;;  %v181_v39 = vadd.f32 %v180_v37, %v179_v35 }
 0x121   :  { %v173_v41 = vadd.f32 %v172_v38, %v171_v36  ;;  %v182_v42 = vrot.slane %v181_v39, 1 }
 0x123   :  { %v174_v44 = vadd.f32 %v173_v41, %v167_v40  ;;  %v183_v45 = vadd.f32 %v182_v42, %v181_v39 }
 0x125   :  { %175 = vst [vmem:[#allocation2] sm:$0x1] %v174_v44  ;;  %v184_v46 = vadd.f32 %v183_v45, %v176_v43 }
 0x127   :  { %185 = vst [vmem:[#allocation3] sm:$0x1] %v184_v46 }
 0x12c   :  { %v189_v47 = vld [vmem:[#allocation2] sm:$0x1] }
 0x12d   :  { %v190_v48 = vmul.f32 0.125, %v189_v47 }
 0x12e   :  { %v191_v49 = vld [vmem:[#allocation3] sm:$0x1] }
 0x12f   :  { %v192_v50 = vmul.f32 0.125, %v191_v49  ;;  %v193_v51 = vmul.f32 %v190_v48, %v190_v48 }
 0x131   :  { %v194_v52 = vsub.f32 %v192_v50, %v193_v51 }
 0x133   :  { %v197_v53 = vadd.f32 1e-05, %v194_v52 }
 0x135   :  { %323 = vrsqrt.f32 %v197_v53 }
 0x13f   :  { %v324_v55 = vpop.eup %323 }
 0x140   :  { %v199_v56 = vmul.f32 %v324_v55, %v195_v54 }
 0x142   :  { %200 = vst [vmem:[#allocation4] sm:$0x1] %v199_v56  ;;  %v201_v58 = vmul.f32 %v199_v56, %v190_v48 }
 0x144   :  { %v202_v59 = vsub.f32 %v196_v57, %v201_v58 }
 0x146   :  { %203 = vst [vmem:[#allocation4 + $0x1] sm:$0x1] %v202_v59 }
 0x147   :  { %336 = shalt.err (!%p333_p4)
}
 0x148   :  { %s337_s26 = scalar_lea.hbm %s468_s3, 32 }
 0x149   :  { %p338_p5 = scmp.ne.s32.totalorder %s468_s3, %s337_s26  ;;  %p341_p6 = scmp.lt.u32.totalorder %s337_s26, %s468_s3 }
 0x14b   :  { %p343_p7 = pnand %p341_p6, %p338_p5 }
 0x14d   :  { %346 = shalt.err (!%p343_p7)
}
 0x14e   :  { %213 = dma.vmem_to_hbm [thread:$0]  %s211_s22, 32, %s468_s3, [#allocation5]  }
 0x14f   :  { %347 = dma.done.wait [#allocation5], 32  }
 0x150   :  { %348 = vsyncadd [#allocation5], 4294967264 }
 0x151   :  { %217 = vsyncpa [#allocation5], 1 }

</bundles_post_ra>
